<compile_context>
chip_gen: v7x
topology: tpu7x:2x2x1
jax: 0.10.0
libtpu: 0.0.40
codegen_flags: <defaults>
</compile_context>

<pallas_src>
import functools

import jax
import jax.numpy as jnp
from jax.experimental import pallas as pl
from jax.experimental.pallas import tpu as pltpu

HIDDEN = 16
OUT = 1
LANE = 128


def mlp_kernel(xT_ref, w1T_ref, b1_ref, w2_ref, b2_ref, o_ref):
    # xT_ref : [D, TILE_B]   features on sublanes, batch on lanes
    # w1T_ref: [H, D]        (fc1 weight, already transposed)
    # b1_ref : [H, 1]
    # w2_ref : [H, 1]
    # b2_ref : SMEM [1]
    # o_ref  : [1, TILE_B]   lane-dense output slab
    # fc1 on the MXU with f32 accumulation: [H, D] @ [D, TILE_B] -> [H, TILE_B]
    h = jnp.dot(w1T_ref[...], xT_ref[...], preferred_element_type=jnp.float32)
    h = jnp.maximum(h + b1_ref[...], 0.0)
    # TODO(synk): dropout(p=0.2) is identity in eval mode; a training-mode stochastic
    # path would use pltpu.prng_seed / pltpu.prng_random_bits (omitted: inference).
    # fc2 as VPU multiply + sublane reduce (XLU) — keeps the MXU free and the
    # [1, TILE_B] result/store full-lane-wide.
    o = jnp.sum(h * w2_ref[...], axis=0, keepdims=True)  # [1, TILE_B]
    o_ref[...] = o + b2_ref[0]


@functools.partial(jax.jit, static_argnames=("tile_b",))
def mlp_forward(x, w1, b1, w2, b2, *, tile_b=1024):
    """x: [B, D] f32; w1: [D, H]; b1: [H]; w2: [H, 1]; b2: [1]. Returns [B, 1]."""
    B, D = x.shape
    H = w1.shape[1]

    # Batch tile: multiple of the 128-lane width, capped so small batches use one tile.
    # At D=32 a 1024-wide f32 tile is only 128 KiB (double-buffered << v7x's 64 MiB VMEM).
    b_ceil = pl.cdiv(B, LANE) * LANE
    tb = max(LANE, (min(tile_b, b_ceil) // LANE) * LANE)
    n_tiles = pl.cdiv(B, tb)
    b_pad = n_tiles * tb

    # Layout plumbing: present x feature-major (batch on lanes) and pad the batch.
    # In a real pipeline the producer would emit this layout directly.
    xT = jnp.pad(x.T, ((0, 0), (0, b_pad - B)))  # [D, b_pad]
    w1T = w1.T                                   # [H, D]
    b1c = b1.reshape(H, 1)
    w2c = w2.reshape(H, OUT)
    b2s = b2.reshape(OUT)                        # scalar, rides in SMEM

    out = pl.pallas_call(
        mlp_kernel,
        out_shape=jax.ShapeDtypeStruct((1, b_pad), jnp.float32),
        grid=(n_tiles,),
        in_specs=[
            pl.BlockSpec((D, tb), lambda i: (0, i)),      # x streams over the batch grid
            pl.BlockSpec((H, D), lambda i: (0, 0)),       # weights stay VMEM-resident
            pl.BlockSpec((H, 1), lambda i: (0, 0)),
            pl.BlockSpec((H, OUT), lambda i: (0, 0)),
            pl.BlockSpec(memory_space=pltpu.MemorySpace.SMEM),
        ],
        out_specs=pl.BlockSpec((1, tb), lambda i: (0, i)),
        compiler_params=pltpu.CompilerParams(
            dimension_semantics=("parallel",),            # megacore sharding on v7x
        ),
    )(xT, w1T, b1c, w2c, b2s)

    return out[0, :B].reshape(B, OUT)


def init_params(key, input_dim):
    # Deterministic init mirroring nn.Linear default: U(-1/sqrt(fan_in), 1/sqrt(fan_in)).
    k1, k2, k3, k4 = jax.random.split(key, 4)
    bound1 = 1.0 / (input_dim ** 0.5)
    w1 = jax.random.uniform(k1, (input_dim, HIDDEN), jnp.float32, -bound1, bound1)
    b1 = jax.random.uniform(k2, (HIDDEN,), jnp.float32, -bound1, bound1)
    bound2 = 1.0 / (HIDDEN ** 0.5)
    w2 = jax.random.uniform(k3, (HIDDEN, OUT), jnp.float32, -bound2, bound2)
    b2 = jax.random.uniform(k4, (OUT,), jnp.float32, -bound2, bound2)
    return w1, b1, w2, b2


if __name__ == "__main__":
    key = jax.random.PRNGKey(0)
    kx, kp, kx2 = jax.random.split(key, 3)

    INPUT_DIM = 32
    w1, b1, w2, b2 = init_params(kp, INPUT_DIM)

    def ref_fn(x):
        # Pure-JAX reference (dropout is identity in eval mode).
        return jnp.maximum(x @ w1 + b1, 0.0) @ w2 + b2

    # Small batch (single tile, padded to one 128-lane block).
    x_small = jax.random.normal(kx, (8, INPUT_DIM), jnp.float32)
    out_small = jax.block_until_ready(mlp_forward(x_small, w1, b1, w2, b2))
    assert out_small.shape == (8, OUT)
    assert jnp.allclose(out_small, ref_fn(x_small), atol=1e-5, rtol=1e-5), "small-batch mismatch"

    # Larger batch exercising the tiled grid + padding path (4 tiles of 256, pad to 1024).
    x_big = jax.random.normal(kx2, (1000, INPUT_DIM), jnp.float32)
    out_big = jax.block_until_ready(mlp_forward(x_big, w1, b1, w2, b2, tile_b=256))
    assert out_big.shape == (1000, OUT)
    assert jnp.allclose(out_big, ref_fn(x_big), atol=1e-5, rtol=1e-5), "big-batch mismatch"

    print("KERNEL_OK")
</pallas_src>

<mosaic_0001>
module attributes {stable_mosaic.version = 11 : i64} {
  func.func @mlp_kernel(%arg0: i32, %arg1: memref<32x128xf32, #tpu.memory_space<vmem>>, %arg2: memref<16x32xf32, #tpu.memory_space<vmem>>, %arg3: memref<16x1xf32, #tpu.memory_space<vmem>>, %arg4: memref<16x1xf32, #tpu.memory_space<vmem>>, %arg5: memref<1xf32, #tpu.memory_space<smem>>, %arg6: memref<1x128xf32, #tpu.memory_space<vmem>>) attributes {dimension_semantics = [#tpu.dimension_semantics<parallel>], iteration_bounds = array<i64: 1>, scalar_prefetch = 0 : i64, scratch_operands = 0 : i64, tpu.core_type = #tpu.core_type<tc>, window_params = [{transform_indices = @transform_0, window_bounds = array<i64: 32, 128>}, {pipeline_mode = #tpu.pipeline_mode<synchronous>, transform_indices = @transform_1, window_bounds = array<i64: 16, 32>}, {pipeline_mode = #tpu.pipeline_mode<synchronous>, transform_indices = @transform_2, window_bounds = array<i64: 16, 1>}, {pipeline_mode = #tpu.pipeline_mode<synchronous>, transform_indices = @transform_3, window_bounds = array<i64: 16, 1>}, {transform_indices = @transform_4, window_bounds = array<i64: 1>}, {transform_indices = @transform_5, window_bounds = array<i64: 1, 128>}]} {
    %c0 = arith.constant 0 : index
    %c0_0 = arith.constant 0 : index
    %0 = vector.load %arg2[%c0, %c0_0] : memref<16x32xf32, #tpu.memory_space<vmem>>, vector<16x32xf32>
    %c0_1 = arith.constant 0 : index
    %c0_2 = arith.constant 0 : index
    %1 = vector.load %arg1[%c0_1, %c0_2] : memref<32x128xf32, #tpu.memory_space<vmem>>, vector<32x128xf32>
    %cst = arith.constant dense<0.000000e+00> : vector<16x128xf32>
    %2 = tpu.matmul %0, %1, %cst {dimension_numbers = #tpu.dot_dimension_numbers<[1], [0], [0], [1], [0, 0, 1, 1], [], []>} : vector<16x32xf32>, vector<32x128xf32>, vector<16x128xf32> -> vector<16x128xf32>
    %c0_3 = arith.constant 0 : index
    %c0_4 = arith.constant 0 : index
    %3 = vector.load %arg3[%c0_3, %c0_4] : memref<16x1xf32, #tpu.memory_space<vmem>>, vector<16x1xf32>
    %4 = vector.broadcast %3 : vector<16x1xf32> to vector<16x128xf32>
    %5 = arith.addf %2, %4 : vector<16x128xf32>
    %cst_5 = arith.constant 0.000000e+00 : f32
    %6 = vector.broadcast %cst_5 : f32 to vector<16x128xf32>
    %7 = arith.maximumf %5, %6 : vector<16x128xf32>
    %c0_6 = arith.constant 0 : index
    %c0_7 = arith.constant 0 : index
    %8 = vector.load %arg4[%c0_6, %c0_7] : memref<16x1xf32, #tpu.memory_space<vmem>>, vector<16x1xf32>
    %9 = vector.broadcast %8 : vector<16x1xf32> to vector<16x128xf32>
    %10 = arith.mulf %7, %9 : vector<16x128xf32>
    %cst_8 = arith.constant dense<0.000000e+00> : vector<128xf32>
    %11 = vector.multi_reduction <add>, %10, %cst_8 [0] : vector<16x128xf32> to vector<128xf32>
    %12 = vector.shape_cast %11 : vector<128xf32> to vector<1x128xf32>
    %c0_9 = arith.constant 0 : index
    %13 = memref.load %arg5[%c0_9] : memref<1xf32, #tpu.memory_space<smem>>
    %14 = vector.broadcast %13 : f32 to vector<1x128xf32>
    %15 = arith.addf %12, %14 : vector<1x128xf32>
    %c0_10 = arith.constant 0 : index
    %c0_11 = arith.constant 0 : index
    %16 = vector.load %arg6[%c0_10, %c0_11] : memref<1x128xf32, #tpu.memory_space<vmem>>, vector<1x128xf32>
    tpu.vector_store %arg6[%c0_10, %c0_11], %15 {strides = array<i32>} : memref<1x128xf32, #tpu.memory_space<vmem>>, vector<1x128xf32>,
    return
  }
  func.func @transform_0(%arg0: i32) -> (i32, i32) {
    %c0_i32 = arith.constant 0 : i32
    %c0_i32_0 = arith.constant 0 : i32
    return %c0_i32, %arg0 : i32, i32
  }
  func.func @transform_1(%arg0: i32) -> (i32, i32) {
    %c0_i32 = arith.constant 0 : i32
    %c0_i32_0 = arith.constant 0 : i32
    %c0_i32_1 = arith.constant 0 : i32
    return %c0_i32, %c0_i32_0 : i32, i32
  }
  func.func @transform_2(%arg0: i32) -> (i32, i32) {
    %c0_i32 = arith.constant 0 : i32
    %c0_i32_0 = arith.constant 0 : i32
    %c0_i32_1 = arith.constant 0 : i32
    return %c0_i32, %c0_i32_0 : i32, i32
  }
  func.func @transform_3(%arg0: i32) -> (i32, i32) {
    %c0_i32 = arith.constant 0 : i32
    %c0_i32_0 = arith.constant 0 : i32
    %c0_i32_1 = arith.constant 0 : i32
    return %c0_i32, %c0_i32_0 : i32, i32
  }
  func.func @transform_4(%arg0: i32) -> i32 {
    %c0_i32 = arith.constant 0 : i32
    %c0_i32_0 = arith.constant 0 : i32
    return %c0_i32 : i32
  }
  func.func @transform_5(%arg0: i32) -> (i32, i32) {
    %c0_i32 = arith.constant 0 : i32
    %c0_i32_0 = arith.constant 0 : i32
    return %c0_i32, %arg0 : i32, i32
  }
}

</mosaic_0001>

<bundles_post_ra>
// kernel: mlp_forward.1
= control target key start
LH: loop header
LB: loop body
LE: loop exit
PB: predicated region body
PF: predicated region fallthrough
CT: control target
= control target key end

     0   :  { %vm39_vm0 = vcmask 261120   ;;  %v182_v3 = vmov 0   ;;  %s251_s0 = inlined_call_operand.vmem [shape: f32[32,128], index: 0, kind: input, shape index: {}]   ;;  %s252_s1 = inlined_call_operand.vmem [shape: f32[16,32], index: 1, kind: input, shape index: {}]   ;;  %s253_s2 = inlined_call_operand.vmem [shape: f32[16,1], index: 2, kind: input, shape index: {}]   ;;  %s254_s3 = inlined_call_operand.vmem [shape: f32[16,1], index: 3, kind: input, shape index: {}]   ;;  %s255_s4 = inlined_call_operand.<no memory space> [shape: f32[1], index: 4, kind: input, shape index: {}]   ;;  %s256_s5 = inlined_call_operand.vmem [shape: f32[1,128], index: 5, kind: output, shape index: {}]  }
   0x1   :  { %v23_v0 = vld [vmem:[%s251_s0] sm:$0xff]  ;;  %v24_v1 = vld [vmem:[%s251_s0 + $0x8] sm:$0xff]  ;;  %v25_v2 = vld [vmem:[%s251_s0 + $0x10] sm:$0xff]  ;;  %180 = vset.pattern.permute.xlu0 %v182_v3  ;;  %181 = vset.pattern.permute.xlu1 %v182_v3  ;;  %v145_v31 = vstv %s255_s4 }
   0x2   :  { %v171_v4 = vpack.c.bf16 %v24_v1, %v23_v0  ;;  %v26_v5 = vld [vmem:[%s251_s0 + $0x18] sm:$0xff]  ;;  %v21_v6 = vld [vmem:[%s252_s1] sm:$0xff]  ;;  %v28_v10 = vld [vmem:[%s253_s2 + $0x8] sm:$0xff] }
   0x3   :  { %v175_v7 = vpack.c.bf16 %v26_v5, %v25_v2  ;;  %168 = vmatprep.mubr.msk.f32.mxu0 %vm39_vm0, %v21_v6  ;;  %v27_v8 = vld [vmem:[%s253_s2] sm:$0xff]  ;;  %v124_v11 = vld [vmem:[%s254_s3 + $0x8] sm:$0xff] }
   0x4   :  { %v123_v9 = vld [vmem:[%s254_s3] sm:$0xff]  ;;  %172 = vmatprep.subr.bf16.mxu0 %v171_v4  ;;  %31 = vperm.xlu0 %180, %v27_v8   ;;  %v22_v12 = vld [vmem:[%s252_s1 + $0x8] sm:$0xff] }
   0x5   :  { %174 = vmatpush3.bf16.msra.mxu0 %v171_v4  ;;  %127 = vperm.xlu1 %181, %v123_v9  }
   0x6   :  { %176 = vmatprep.subr.bf16.mxu0 %v175_v7 }
   0x8   :  { %36 = vperm.xlu0 %180, %v28_v10  }
   0x9   :  { %178 = vmatpush3.bf16.msra.mxu0 %v175_v7  ;;  %132 = vperm.xlu1 %181, %v124_v11  }
   0xc   :  { %169 = vmatmul.mubr.msk.f32.vlgmr.msra.gmra.mrb[0].mxu0 %vm39_vm0, %v22_v12 }
  0x83   :  { %v32_v13 = vpop.permute.xlu0 %31 }
  0x84   :  { %v128_v14 = vpop.permute.xlu1 %127 }
  0x87   :  { %v37_v15 = vpop.permute.xlu0 %36 }
  0x88   :  { %v133_v21 = vpop.permute.xlu1 %132 }
  0xdf   :  { %v170_v16 = vpop.f32.mrb[0].mxu0 }
  0xe0   :  { %v118_v17 = vadd.f32 %v170_v16, %v37_v15  ;;  %v112_v18 = vpop.f32.mrb[1].mxu0 }
  0xe1   :  { %v113_v19 = vadd.f32 %v112_v18, %v32_v13 }
  0xe2   :  { %v122_v20 = vmax.f32 %v118_v17, 0.0 }
  0xe3   :  { %v121_v22 = vmax.f32 %v113_v19, 0.0 }
  0xe4   :  { %v136_v23 = vmul.f32 %v133_v21, %v122_v20 }
  0xe5   :  { %v135_v24 = vmul.f32 %v128_v14, %v121_v22 }
  0xe7   :  { %v137_v25 = vadd.f32 %v136_v23, %v135_v24 }
  0xe9   :  { %v138_v26 = vrot.slane %v137_v25, 4 }
  0xeb   :  { %v139_v27 = vadd.f32 %v138_v26, %v137_v25 }
  0xed   :  { %v140_v28 = vrot.slane %v139_v27, 2 }
  0xef   :  { %v141_v29 = vadd.f32 %v140_v28, %v139_v27 }
  0xf1   :  { %v142_v30 = vrot.slane %v141_v29, 1 }
  0xf3   :  { %v143_v32 = vadd.f32 %v142_v30, %v141_v29 }
  0xf5   :  { %v146_v33 = vadd.f32 %v145_v31, %v143_v32 }
  0xf7   :  { %147 = vst [vmem:[%s256_s5] sm:$0x1] %v146_v33 }

</bundles_post_ra>
